<compile_context>
chip_gen: v5e
topology: v5e:2x2
jax: 0.10.0
libtpu: 0.0.40
codegen_flags: <defaults>
</compile_context>

<pallas_src>
import jax
import jax.numpy as jnp
from jax import lax
from jax.experimental import pallas as pl
from jax.experimental.pallas import tpu as pltpu


CONV_K = 80
CONV_OUT = 64
FC1_OUT = 10240


# ----------------------------------------------------------------------------- kernel
def _matmul_bias_relu_kernel(x_ref, w_ref, b_ref, o_ref):
    """Single K-step relu(x @ w + b); f32 accumulation on the MXU."""
    acc = jnp.dot(x_ref[...], w_ref[...], preferred_element_type=jnp.float32)
    o_ref[...] = jnp.maximum(acc + b_ref[...], 0.0).astype(o_ref.dtype)


def matmul_bias_relu(x, w, b, *, tn=None, out_dtype=jnp.float32,
                     vmem_limit_bytes=None):
    """relu(x @ w + b) with x:(M,K), w:(K,N), b:(N,) -> (M,N).

    The whole K dimension is consumed in one step (no reduction grid / scratch);
    the grid tiles only N, marked "parallel" so v7x megacore shards the weight stream.
    Input dtypes are preserved (pass bf16 x/w to stream weights at half the HBM bytes).
    """
    M, K = x.shape
    K2, N = w.shape
    assert K == K2, (K, K2)
    tn = N if tn is None else tn
    assert N % tn == 0, (N, tn)
    b2 = b.reshape(1, N).astype(jnp.float32)

    cp_kwargs = dict(dimension_semantics=("parallel",))
    if vmem_limit_bytes is not None:
        cp_kwargs["vmem_limit_bytes"] = vmem_limit_bytes

    return pl.pallas_call(
        _matmul_bias_relu_kernel,
        out_shape=jax.ShapeDtypeStruct((M, N), out_dtype),
        grid_spec=pltpu.PrefetchScalarGridSpec(
            num_scalar_prefetch=0,
            grid=(N // tn,),
            in_specs=[
                pl.BlockSpec((M, K), lambda j: (0, 0)),
                pl.BlockSpec((K, tn), lambda j: (0, j)),
                pl.BlockSpec((1, tn), lambda j: (0, j)),
            ],
            out_specs=pl.BlockSpec((M, tn), lambda j: (0, j)),
        ),
        compiler_params=pltpu.CompilerParams(**cp_kwargs),
    )(x, w, b2)


# ----------------------------------------------------------------------------- params
def prepare_params(params, l_out):
    """One-time (offline) conversion of PyTorch-layout params to kernel layout.

    * conv weight -> im2col matrix (C*K, 64), f32.
    * fc1 weight rows permuted from PyTorch's channel-major flatten order (c*96 + p)
      to the (position, channel) order (p*64 + c) the conv kernel emits, then bf16.
    * fc2 weight bf16.
    """
    conv_w = params["conv_w"]                                   # (64, C, 80)
    C = conv_w.shape[1]
    w_col = conv_w.reshape(CONV_OUT, C * CONV_K).T.astype(jnp.float32)   # (C*80, 64)

    w1t = params["w1t"]                                         # (6144, 10240), rows c*96+p
    n_out = w1t.shape[1]
    w1p = (w1t.reshape(CONV_OUT, l_out, n_out)
               .transpose(1, 0, 2)
               .reshape(l_out * CONV_OUT, n_out)
               .astype(jnp.bfloat16))                           # rows p*64+c

    return {
        "conv_wcol": w_col,
        "conv_b": params["conv_b"].astype(jnp.float32),
        "w1p": w1p,
        "b1": params["b1"].astype(jnp.float32),
        "w2t": params["w2t"].astype(jnp.bfloat16),
        "b2": params["b2"].astype(jnp.float32),
    }


# ----------------------------------------------------------------------------- model
def conv_encoder_forward(x, kp):
    """x: (C, L) with L = 175. kp: prepared params. Returns (feature_size,) f32."""
    C, L = x.shape
    l_out = L - CONV_K + 1                                       # 96

    # --- im2col (glue: pure data movement, done in XLA) ---------------------
    idx = jnp.arange(l_out)[:, None] + jnp.arange(CONV_K)[None, :]   # (96, 80)
    xg = x[:, idx]                                                   # (C, 96, 80)
    x_col = (jnp.transpose(xg, (1, 0, 2))
                .reshape(l_out, C * CONV_K)
                .astype(jnp.float32))                                # (96, C*80)

    # --- conv1d + relu as a (tiny, untuned) Pallas matmul, f32 ---------------
    h_conv = matmul_bias_relu(x_col, kp["conv_wcol"], kp["conv_b"])  # (96, 64) f32

    # w1 rows are pre-permuted to (position, channel) order -> plain reshape.
    h_flat = h_conv.reshape(1, -1).astype(jnp.bfloat16)              # (1, 6144) bf16

    # --- fc1 + relu: 6144 -> 10240, bf16 weight stream, grid=(10,) -----------
    h1 = matmul_bias_relu(
        h_flat, kp["w1p"], kp["b1"],
        tn=1024,
        out_dtype=jnp.bfloat16,
        vmem_limit_bytes=48 * 1024 * 1024,
    )                                                                # (1, 10240) bf16

    # --- fc2 + relu: 10240 -> feature_size, single step ----------------------
    h2 = matmul_bias_relu(h1, kp["w2t"], kp["b2"])                   # (1, feat) f32
    return h2.reshape(-1)


def reference_forward(x, params):
    """Pure-JAX reference mirroring the PyTorch forward (f32, HIGHEST precision)."""
    C, L = x.shape
    l_out = L - CONV_K + 1
    idx = jnp.arange(l_out)[:, None] + jnp.arange(CONV_K)[None, :]
    xg = x[:, idx]                                                   # (C, 96, 80)
    conv = jnp.einsum(
        "clk,ock->ol", xg, params["conv_w"], precision=lax.Precision.HIGHEST
    ) + params["conv_b"][:, None]                                    # (64, 96)
    h = jnp.maximum(conv, 0.0).reshape(-1)                           # channel-major flatten
    h = jnp.maximum(
        jnp.dot(h, params["w1t"], precision=lax.Precision.HIGHEST) + params["b1"], 0.0)
    h = jnp.maximum(
        jnp.dot(h, params["w2t"], precision=lax.Precision.HIGHEST) + params["b2"], 0.0)
    return h


# ----------------------------------------------------------------------------- main
if __name__ == "__main__":
    key = jax.random.PRNGKey(0)
    ks = jax.random.split(key, 7)

    C = 4            # input channels (arbitrary; conv1 is built from x.shape[0])
    L = 175          # forced by fc1 in_features = 96*64  (175 - 80 + 1 = 96)
    L_OUT = L - CONV_K + 1
    FEATURE_SIZE = 128

    x = jax.random.normal(ks[0], (C, L), jnp.float32)

    # Params in PyTorch convention (fc weights stored pre-transposed: (in, out)).
    params = {
        "conv_w": 0.05 * jax.random.normal(ks[1], (CONV_OUT, C, CONV_K), jnp.float32),
        "conv_b": 0.05 * jax.random.normal(ks[2], (CONV_OUT,), jnp.float32),
        "w1t": 0.01 * jax.random.normal(ks[3], (L_OUT * CONV_OUT, FC1_OUT), jnp.float32),
        "b1": 0.01 * jax.random.normal(ks[4], (FC1_OUT,), jnp.float32),
        "w2t": 0.01 * jax.random.normal(ks[5], (FC1_OUT, FEATURE_SIZE), jnp.float32),
        "b2": 0.01 * jax.random.normal(ks[6], (FEATURE_SIZE,), jnp.float32),
    }
    kernel_params = prepare_params(params, L_OUT)

    out = jax.block_until_ready(conv_encoder_forward(x, kernel_params))
    ref = jax.block_until_ready(reference_forward(x, params))

    assert out.shape == (FEATURE_SIZE,), out.shape
    # bf16 weight/activation streaming vs. HIGHEST-precision f32 reference.
    assert jnp.allclose(out, ref, rtol=3e-2, atol=3e-2), (
        float(jnp.max(jnp.abs(out - ref)))
    )
    print("KERNEL_OK")
</pallas_src>

<mosaic_0001>
module attributes {stable_mosaic.version = 11 : i64} {
  func.func @_matmul_bias_relu_kernel(%arg0: i32, %arg1: memref<96x320xf32, #tpu.memory_space<vmem>>, %arg2: memref<320x64xf32, #tpu.memory_space<vmem>>, %arg3: memref<1x64xf32, #tpu.memory_space<vmem>>, %arg4: memref<96x64xf32, #tpu.memory_space<vmem>>) attributes {dimension_semantics = [#tpu.dimension_semantics<parallel>], iteration_bounds = array<i64: 1>, scalar_prefetch = 0 : i64, scratch_operands = 0 : i64, tpu.core_type = #tpu.core_type<tc>, window_params = [{pipeline_mode = #tpu.pipeline_mode<synchronous>, transform_indices = @transform_0, window_bounds = array<i64: 96, 320>}, {transform_indices = @transform_1, window_bounds = array<i64: 320, 64>}, {transform_indices = @transform_2, window_bounds = array<i64: 1, 64>}, {transform_indices = @transform_3, window_bounds = array<i64: 96, 64>}]} {
    %c0 = arith.constant 0 : index
    %c0_0 = arith.constant 0 : index
    %0 = vector.load %arg1[%c0, %c0_0] : memref<96x320xf32, #tpu.memory_space<vmem>>, vector<96x320xf32>
    %c0_1 = arith.constant 0 : index
    %c0_2 = arith.constant 0 : index
    %1 = vector.load %arg2[%c0_1, %c0_2] : memref<320x64xf32, #tpu.memory_space<vmem>>, vector<320x64xf32>
    %cst = arith.constant dense<0.000000e+00> : vector<96x64xf32>
    %2 = tpu.matmul %0, %1, %cst {dimension_numbers = #tpu.dot_dimension_numbers<[1], [0], [0], [1], [0, 0, 1, 1], [], []>} : vector<96x320xf32>, vector<320x64xf32>, vector<96x64xf32> -> vector<96x64xf32>
    %c0_3 = arith.constant 0 : index
    %c0_4 = arith.constant 0 : index
    %3 = vector.load %arg3[%c0_3, %c0_4] : memref<1x64xf32, #tpu.memory_space<vmem>>, vector<1x64xf32>
    %4 = vector.broadcast %3 : vector<1x64xf32> to vector<96x64xf32>
    %5 = arith.addf %2, %4 : vector<96x64xf32>
    %cst_5 = arith.constant 0.000000e+00 : f32
    %6 = vector.broadcast %cst_5 : f32 to vector<96x64xf32>
    %7 = arith.maximumf %5, %6 : vector<96x64xf32>
    %c0_6 = arith.constant 0 : index
    %c0_7 = arith.constant 0 : index
    %8 = vector.load %arg4[%c0_6, %c0_7] : memref<96x64xf32, #tpu.memory_space<vmem>>, vector<96x64xf32>
    tpu.vector_store %arg4[%c0_6, %c0_7], %7 {strides = array<i32>} : memref<96x64xf32, #tpu.memory_space<vmem>>, vector<96x64xf32>,
    return
  }
  func.func @transform_0(%arg0: i32) -> (i32, i32) {
    %c0_i32 = arith.constant 0 : i32
    %c0_i32_0 = arith.constant 0 : i32
    %c0_i32_1 = arith.constant 0 : i32
    return %c0_i32, %c0_i32_0 : i32, i32
  }
  func.func @transform_1(%arg0: i32) -> (i32, i32) {
    %c0_i32 = arith.constant 0 : i32
    %c0_i32_0 = arith.constant 0 : i32
    return %c0_i32, %arg0 : i32, i32
  }
  func.func @transform_2(%arg0: i32) -> (i32, i32) {
    %c0_i32 = arith.constant 0 : i32
    %c0_i32_0 = arith.constant 0 : i32
    return %c0_i32, %arg0 : i32, i32
  }
  func.func @transform_3(%arg0: i32) -> (i32, i32) {
    %c0_i32 = arith.constant 0 : i32
    %c0_i32_0 = arith.constant 0 : i32
    return %c0_i32, %arg0 : i32, i32
  }
}

</mosaic_0001>

<bundles_post_ra>
// kernel: tpu_custom_call.1
= control target key start
LH: loop header
LB: loop body
LE: loop exit
PB: predicated region body
PF: predicated region fallthrough
CT: control target
= control target key end

     0   :  { %vm94_vm0 = vcmask 523264   ;;  %s779_s1 = inlined_call_operand.vmem [shape: f32[320,64], index: 1, kind: input, shape index: {}]   ;;  %s780_s0 = inlined_call_operand.vmem [shape: f32[96,320], index: 0, kind: input, shape index: {}]   ;;  %s781_s2 = inlined_call_operand.vmem [shape: f32[1,64], index: 2, kind: input, shape index: {}]   ;;  %s782_s3 = inlined_call_operand.vmem [shape: f32[96,64], index: 3, kind: output, shape index: {}]  }
   0x1   :  { %v65_v0 = vld [vmem:[%s779_s1 + $0x78] sm:$0xff]  ;;  %v64_v2 = vld [vmem:[%s779_s1 + $0x70] sm:$0xff]  ;;  %v63_v5 = vld [vmem:[%s779_s1 + $0x68] sm:$0xff] }
   0x2   :  { %v397_v1 = vld [vmem:[%s779_s1 + $0x138] sm:$0xff]  ;;  %131 = vmatpush.msra.mxu0 %v65_v0  ;;  %330 = vmatpush.msra.mxu3 %v65_v0  ;;  %v410_v4 = vld [vmem:[%s779_s1 + $0x130] sm:$0xff]  ;;  %v425_v7 = vld [vmem:[%s779_s1 + $0x128] sm:$0xff] }
   0x3   :  { %v405_v3 = vld [vmem:[%s779_s1 + $0xf8] sm:$0xff]  ;;  %245 = vmatpush.msra.mxu2 %v397_v1  ;;  %v420_v6 = vld [vmem:[%s779_s1 + $0xf0] sm:$0xff]  ;;  %v430_v8 = vld [vmem:[%s779_s1 + $0xe8] sm:$0xff] }
   0x4   :  { %184 = vmatpush.msra.mxu1 %v405_v3  ;;  %132 = vmatpush.msra.mxu0 %v64_v2  ;;  %v62_v9 = vld [vmem:[%s779_s1 + $0x60] sm:$0xff]  ;;  %v61_v12 = vld [vmem:[%s779_s1 + $0x58] sm:$0xff]  ;;  %v60_v15 = vld [vmem:[%s779_s1 + $0x50] sm:$0xff] }
   0x5   :  { %331 = vmatpush.msra.mxu3 %v64_v2  ;;  %246 = vmatpush.msra.mxu2 %v410_v4  ;;  %v440_v10 = vld [vmem:[%s779_s1 + $0x120] sm:$0xff]  ;;  %v455_v13 = vld [vmem:[%s779_s1 + $0x118] sm:$0xff]  ;;  %v470_v16 = vld [vmem:[%s779_s1 + $0x110] sm:$0xff] }
   0x6   :  { %185 = vmatpush.msra.mxu1 %v420_v6  ;;  %133 = vmatpush.msra.mxu0 %v63_v5  ;;  %v445_v11 = vld [vmem:[%s779_s1 + $0xe0] sm:$0xff]  ;;  %v460_v14 = vld [vmem:[%s779_s1 + $0xd8] sm:$0xff]  ;;  %v475_v17 = vld [vmem:[%s779_s1 + $0xd0] sm:$0xff] }
   0x7   :  { %332 = vmatpush.msra.mxu3 %v63_v5  ;;  %247 = vmatpush.msra.mxu2 %v425_v7  ;;  %v59_v18 = vld [vmem:[%s779_s1 + $0x48] sm:$0xff]  ;;  %v58_v21 = vld [vmem:[%s779_s1 + $0x40] sm:$0xff]  ;;  %v16_v24 = vld [vmem:[%s780_s0 + $0x10] sm:$0xff] }
   0x8   :  { %186 = vmatpush.msra.mxu1 %v430_v8  ;;  %134 = vmatpush.msra.mxu0 %v62_v9  ;;  %v485_v19 = vld [vmem:[%s779_s1 + $0x108] sm:$0xff]  ;;  %v500_v22 = vld [vmem:[%s779_s1 + $0x100] sm:$0xff]  ;;  %v57_v25 = vld [vmem:[%s779_s1 + $0x38] sm:$0xff] }
   0x9   :  { %333 = vmatpush.msra.mxu3 %v62_v9  ;;  %248 = vmatpush.msra.mxu2 %v440_v10  ;;  %v490_v20 = vld [vmem:[%s779_s1 + $0xc8] sm:$0xff]  ;;  %v505_v23 = vld [vmem:[%s779_s1 + $0xc0] sm:$0xff]  ;;  %v518_v26 = vld [vmem:[%s779_s1 + $0xb8] sm:$0xff] }
   0xa   :  { %187 = vmatpush.msra.mxu1 %v445_v11  ;;  %135 = vmatpush.msra.mxu0 %v61_v12  ;;  %v56_v27 = vld [vmem:[%s779_s1 + $0x30] sm:$0xff]  ;;  %v55_v29 = vld [vmem:[%s779_s1 + $0x28] sm:$0xff]  ;;  %v54_v31 = vld [vmem:[%s779_s1 + $0x20] sm:$0xff] }
   0xb   :  { %334 = vmatpush.msra.mxu3 %v61_v12  ;;  %249 = vmatpush.msra.mxu2 %v455_v13  ;;  %v529_v28 = vld [vmem:[%s779_s1 + $0xb0] sm:$0xff]  ;;  %v538_v30 = vld [vmem:[%s779_s1 + $0xa8] sm:$0xff]  ;;  %v547_v32 = vld [vmem:[%s779_s1 + $0xa0] sm:$0xff] }
   0xc   :  { %188 = vmatpush.msra.mxu1 %v460_v14  ;;  %136 = vmatpush.msra.mxu0 %v60_v15  ;;  %v19_v33 = vld [vmem:[%s780_s0 + $0x28] sm:$0xff]  ;;  %v53_v34 = vld [vmem:[%s779_s1 + $0x18] sm:$0xff]  ;;  %v52_v36 = vld [vmem:[%s779_s1 + $0x10] sm:$0xff] }
   0xd   :  { %335 = vmatpush.msra.mxu3 %v60_v15  ;;  %250 = vmatpush.msra.mxu2 %v470_v16  ;;  %v69_v35 = vld [vmem:[%s779_s1 + $0x98] sm:$0xff]  ;;  %v68_v37 = vld [vmem:[%s779_s1 + $0x90] sm:$0xff]  ;;  %v51_v38 = vld [vmem:[%s779_s1 + $0x8] sm:$0xff] }
   0xe   :  { %189 = vmatpush.msra.mxu1 %v475_v17  ;;  %137 = vmatpush.msra.mxu0 %v59_v18  ;;  %v67_v39 = vld [vmem:[%s779_s1 + $0x88] sm:$0xff]  ;;  %v50_v40 = vld [vmem:[%s779_s1] sm:$0xff]  ;;  %v41_v44 = vld [vmem:[%s780_s0 + $0xd8] sm:$0xff] }
   0xf   :  { %336 = vmatpush.msra.mxu3 %v59_v18  ;;  %251 = vmatpush.msra.mxu2 %v485_v19  ;;  %v14_v41 = vld [vmem:[%s780_s0] sm:$0xff]  ;;  %v15_v45 = vld [vmem:[%s780_s0 + $0x8] sm:$0xff]  ;;  %v17_v46 = vld [vmem:[%s780_s0 + $0x18] sm:$0xff] }
  0x10   :  { %190 = vmatpush.msra.mxu1 %v490_v20  ;;  %138 = vmatpush.msra.mxu0 %v58_v21  ;;  %v22_v42 = vld [vmem:[%s780_s0 + $0x40] sm:$0xff]  ;;  %v25_v47 = vld [vmem:[%s780_s0 + $0x58] sm:$0xff]  ;;  %v44_v48 = vld [vmem:[%s780_s0 + $0xf0] sm:$0xff] }
  0x11   :  { %337 = vmatpush.msra.mxu3 %v58_v21  ;;  %252 = vmatpush.msra.mxu2 %v500_v22  ;;  %v66_v43 = vld [vmem:[%s779_s1 + $0x80] sm:$0xff]  ;;  %v20_v50 = vld [vmem:[%s780_s0 + $0x30] sm:$0xff]  ;;  %v47_v52 = vld [vmem:[%s780_s0 + $0x108] sm:$0xff] }
  0x12   :  { %191 = vmatpush.msra.mxu1 %v505_v23  ;;  %318 = vmatmul.msk.f32.vlgmr.msra.gmra.mxu2 %vm94_vm0, %v16_v24  ;;  %v18_v49 = vld [vmem:[%s780_s0 + $0x20] sm:$0xff]  ;;  %v28_v51 = vld [vmem:[%s780_s0 + $0x70] sm:$0xff]  ;;  %v21_v53 = vld [vmem:[%s780_s0 + $0x38] sm:$0xff] }
  0x13   :  { %139 = vmatpush.msra.mxu0 %v57_v25  ;;  %338 = vmatpush.msra.mxu3 %v57_v25  ;;  %v23_v54 = vld [vmem:[%s780_s0 + $0x48] sm:$0xff]  ;;  %v24_v56 = vld [vmem:[%s780_s0 + $0x50] sm:$0xff]  ;;  %v42_v57 = vld [vmem:[%s780_s0 + $0xe0] sm:$0xff] }
  0x14   :  { %192 = vmatpush.msra.mxu1 %v518_v26  ;;  %v31_v55 = vld [vmem:[%s780_s0 + $0x88] sm:$0xff]  ;;  %v26_v58 = vld [vmem:[%s780_s0 + $0x60] sm:$0xff]  ;;  %v45_v61 = vld [vmem:[%s780_s0 + $0xf8] sm:$0xff] }
  0x15   :  { %140 = vmatpush.msra.mxu0 %v56_v27  ;;  %339 = vmatpush.msra.mxu3 %v56_v27  ;;  %v34_v59 = vld [vmem:[%s780_s0 + $0xa0] sm:$0xff]  ;;  %v27_v60 = vld [vmem:[%s780_s0 + $0x68] sm:$0xff]  ;;  %v29_v62 = vld [vmem:[%s780_s0 + $0x78] sm:$0xff] }
  0x16   :  { %193 = vmatpush.msra.mxu1 %v529_v28  ;;  %v37_v63 = vld [vmem:[%s780_s0 + $0xb8] sm:$0xff]  ;;  %v30_v0 = vld [vmem:[%s780_s0 + $0x80] sm:$0xff]  ;;  %v32_v2 = vld [vmem:[%s780_s0 + $0x90] sm:$0xff] }
  0x17   :  { %141 = vmatpush.msra.mxu0 %v55_v29  ;;  %340 = vmatpush.msra.mxu3 %v55_v29  ;;  %v49_v5 = vld [vmem:[%s780_s0 + $0x118] sm:$0xff]  ;;  %v38_v9 = vld [vmem:[%s780_s0 + $0xc0] sm:$0xff] }
  0x18   :  { %194 = vmatpush.msra.mxu1 %v538_v30 }
  0x19   :  { %142 = vmatpush.msra.mxu0 %v54_v31  ;;  %341 = vmatpush.msra.mxu3 %v54_v31 }
  0x1a   :  { %195 = vmatpush.msra.mxu1 %v547_v32  ;;  %319 = vmatmul.msk.f32.gmra.mxu2 %vm94_vm0, %v19_v33 }
  0x1b   :  { %143 = vmatpush.msra.mxu0 %v53_v34  ;;  %342 = vmatpush.msra.mxu3 %v53_v34 }
  0x1c   :  { %196 = vmatpush.msra.mxu1 %v69_v35 }
  0x1d   :  { %144 = vmatpush.msra.mxu0 %v52_v36  ;;  %343 = vmatpush.msra.mxu3 %v52_v36 }
  0x1e   :  { %197 = vmatpush.msra.mxu1 %v68_v37 }
  0x1f   :  { %145 = vmatpush.msra.mxu0 %v51_v38  ;;  %344 = vmatpush.msra.mxu3 %v51_v38 }
  0x20   :  { %198 = vmatpush.msra.mxu1 %v67_v39 }
  0x21   :  { %146 = vmatpush.msra.mxu0 %v50_v40  ;;  %345 = vmatpush.msra.mxu3 %v50_v40 }
  0x22   :  { %147 = vmatmul.f32.vlgmr.msra.gmra.mxu0 %v14_v41  ;;  %320 = vmatmul.msk.f32.gmra.mxu2 %vm94_vm0, %v22_v42 }
  0x23   :  { %346 = vmatpush.msrb.mxu3 %v405_v3  ;;  %199 = vmatpush.msra.mxu1 %v66_v43  ;;  %v40_v3 = vld [vmem:[%s780_s0 + $0xd0] sm:$0xff] }
  0x24   :  { %174 = vmatmul.f32.vlgmr.msra.gmra.mxu3 %v41_v44  ;;  %200 = vmatmul.f32.vlgmr.msra.gmra.mxu1 %v15_v45 }
  0x25   :  { %347 = vmatpush.msrb.mxu3 %v420_v6  ;;  %v35_v6 = vld [vmem:[%s780_s0 + $0xa8] sm:$0xff] }
  0x27   :  { %348 = vmatpush.msrb.mxu3 %v430_v8  ;;  %v36_v8 = vld [vmem:[%s780_s0 + $0xb0] sm:$0xff] }
  0x29   :  { %349 = vmatpush.msrb.mxu3 %v445_v11  ;;  %v39_v11 = vld [vmem:[%s780_s0 + $0xc8] sm:$0xff] }
  0x2a   :  { %150 = vmatmul.f32.gmra.mxu0 %v17_v46  ;;  %321 = vmatmul.msk.f32.gmra.mxu2 %vm94_vm0, %v25_v47 }
  0x2b   :  { %350 = vmatpush.msrb.mxu3 %v460_v14 }
  0x2c   :  { %177 = vmatmul.f32.gmra.mxu3 %v44_v48  ;;  %203 = vmatmul.f32.gmra.mxu1 %v18_v49 }
  0x2d   :  { %351 = vmatpush.msrb.mxu3 %v475_v17 }
  0x2f   :  { %352 = vmatpush.msrb.mxu3 %v490_v20 }
  0x31   :  { %353 = vmatpush.msrb.mxu3 %v505_v23 }
  0x32   :  { %153 = vmatmul.f32.gmra.mxu0 %v20_v50  ;;  %322 = vmatmul.msk.f32.gmra.mxu2 %vm94_vm0, %v28_v51 }
  0x33   :  { %354 = vmatpush.msrb.mxu3 %v518_v26 }
  0x34   :  { %180 = vmatmul.f32.gmra.mxu3 %v47_v52  ;;  %206 = vmatmul.f32.gmra.mxu1 %v21_v53 }
  0x35   :  { %355 = vmatpush.msrb.mxu3 %v529_v28 }
  0x37   :  { %356 = vmatpush.msrb.mxu3 %v538_v30 }
  0x39   :  { %357 = vmatpush.msrb.mxu3 %v547_v32 }
  0x3a   :  { %156 = vmatmul.f32.gmra.mxu0 %v23_v54  ;;  %323 = vmatmul.msk.f32.gmra.mxu2 %vm94_vm0, %v31_v55 }
  0x3b   :  { %358 = vmatpush.msrb.mxu3 %v69_v35 }
  0x3c   :  { %209 = vmatmul.f32.gmra.mxu1 %v24_v56 }
  0x3d   :  { %359 = vmatpush.msrb.mxu3 %v68_v37 }
  0x3f   :  { %360 = vmatpush.msrb.mxu3 %v67_v39 }
  0x41   :  { %361 = vmatpush.msrb.mxu3 %v66_v43 }
  0x42   :  { %227 = vmatmul.f32.vlgmr.msrb.gmra.mxu3 %v42_v57  ;;  %159 = vmatmul.f32.gmra.mxu0 %v26_v58 }
  0x43   :  { %324 = vmatmul.msk.f32.gmra.mxu2 %vm94_vm0, %v34_v59  ;;  %362 = vmatpush.msra.mxu3 %v397_v1  ;;  %v48_v1 = vld [vmem:[%s780_s0 + $0x110] sm:$0xff] }
  0x44   :  { %212 = vmatmul.f32.gmra.mxu1 %v27_v60 }
  0x45   :  { %363 = vmatpush.msra.mxu3 %v410_v4  ;;  %v33_v4 = vld [vmem:[%s780_s0 + $0x98] sm:$0xff] }
  0x47   :  { %364 = vmatpush.msra.mxu3 %v425_v7  ;;  %v43_v7 = vld [vmem:[%s780_s0 + $0xe8] sm:$0xff] }
  0x49   :  { %365 = vmatpush.msra.mxu3 %v440_v10  ;;  %v46_v10 = vld [vmem:[%s780_s0 + $0x100] sm:$0xff] }
  0x4a   :  { %230 = vmatmul.f32.gmra.mxu3 %v45_v61  ;;  %162 = vmatmul.f32.gmra.mxu0 %v29_v62 }
  0x4b   :  { %325 = vmatmul.msk.f32.gmra.mxu2 %vm94_vm0, %v37_v63  ;;  %366 = vmatpush.msra.mxu3 %v455_v13  ;;  %v714_v13 = vld [vmem:[%s781_s2] ss:$0 sm:$0xff] }
  0x4c   :  { %215 = vmatmul.f32.gmra.mxu1 %v30_v0 }
  0x4d   :  { %367 = vmatpush.msra.mxu3 %v470_v16 }
  0x4f   :  { %368 = vmatpush.msra.mxu3 %v485_v19 }
  0x51   :  { %369 = vmatpush.msra.mxu3 %v500_v22 }
  0x52   :  { %233 = vmatmul.f32.gmra.mxu3 %v48_v1  ;;  %165 = vmatmul.f32.gmra.mxu0 %v32_v2 }
  0x53   :  { %326 = vmatmul.msk.f32.gmra.mxu2 %vm94_vm0, %v40_v3 }
  0x54   :  { %218 = vmatmul.f32.gmra.mxu1 %v33_v4 }
  0x5a   :  { %329 = vmatmul.msk.f32.vlgmr.msra.gmra.mxu3 %vm94_vm0, %v49_v5  ;;  %168 = vmatmul.f32.gmra.mxu0 %v35_v6 }
  0x5b   :  { %327 = vmatmul.msk.f32.gmra.mxu2 %vm94_vm0, %v43_v7 }
  0x5c   :  { %221 = vmatmul.f32.gmra.mxu1 %v36_v8 }
  0x62   :  { %171 = vmatmul.f32.gmra.mxu0 %v38_v9 }
  0x63   :  { %328 = vmatmul.msk.f32.gmra.mxu2 %vm94_vm0, %v46_v10 }
  0x64   :  { %224 = vmatmul.f32.gmra.mxu1 %v39_v11 }
  0x95   :  { %v254_v12 = vpop.f32.mrf.mxu2 }
  0x9d   :  { %v257_v14 = vpop.f32.mrf.mxu2 }
  0x9f   :  { %v148_v15 = vpop.f32.mrf.mxu0 }
  0xa0   :  { %v149_v16 = vadd.f32 %v714_v13, %v148_v15 }
  0xa1   :  { %v201_v17 = vpop.f32.mrf.mxu1 }
  0xa2   :  { %v202_v18 = vadd.f32 %v201_v17, %v149_v16 }
  0xa4   :  { %v255_v19 = vadd.f32 %v254_v12, %v202_v18 }
  0xa5   :  { %v260_v20 = vpop.f32.mrf.mxu2 }
  0xa6   :  { %v290_v21 = vmax.f32 %v255_v19, 0.0 }
  0xa7   :  { %v151_v22 = vpop.f32.mrf.mxu0  ;;  %v175_v23 = vpop.f32.mrf.mxu3 }
  0xa8   :  { %v152_v24 = vadd.f32 %v714_v13, %v151_v22  ;;  %302 = vst.msk [vmem:[%s782_s3] sm:$0xff] %vm94_vm0, %v290_v21  ;;  %v176_v10 = vadd.f32 %v714_v13, %v175_v23 }
  0xa9   :  { %v204_v25 = vpop.f32.mrf.mxu1 }
  0xaa   :  { %v205_v26 = vadd.f32 %v204_v25, %v152_v24 }
  0xac   :  { %v258_v27 = vadd.f32 %v257_v14, %v205_v26 }
  0xad   :  { %v263_v28 = vpop.f32.mrf.mxu2 }
  0xae   :  { %v291_v29 = vmax.f32 %v258_v27, 0.0 }
  0xaf   :  { %v154_v30 = vpop.f32.mrf.mxu0  ;;  %v727_v32 = vpop.f32.mrf.mxu3 }
  0xb0   :  { %v155_v31 = vadd.f32 %v714_v13, %v154_v30  ;;  %303 = vst.msk [vmem:[%s782_s3 + $0x8] sm:$0xff] %vm94_vm0, %v291_v29  ;;  %v179_v26 = vadd.f32 %v714_v13, %v727_v32 }
  0xb1   :  { %v207_v33 = vpop.f32.mrf.mxu1 }
  0xb2   :  { %v208_v34 = vadd.f32 %v207_v33, %v155_v31 }
  0xb4   :  { %v261_v35 = vadd.f32 %v260_v20, %v208_v34 }
  0xb5   :  { %v266_v36 = vpop.f32.mrf.mxu2 }
  0xb6   :  { %v292_v37 = vmax.f32 %v261_v35, 0.0 }
  0xb7   :  { %v157_v38 = vpop.f32.mrf.mxu0  ;;  %v181_v42 = vpop.f32.mrf.mxu3 }
  0xb8   :  { %v158_v39 = vadd.f32 %v714_v13, %v157_v38  ;;  %304 = vst.msk [vmem:[%s782_s3 + $0x10] sm:$0xff] %vm94_vm0, %v292_v37  ;;  %v182_v8 = vadd.f32 %v714_v13, %v181_v42 }
  0xb9   :  { %v210_v40 = vpop.f32.mrf.mxu1 }
  0xba   :  { %v211_v41 = vadd.f32 %v210_v40, %v158_v39 }
  0xbc   :  { %v264_v43 = vadd.f32 %v263_v28, %v211_v41 }
  0xbd   :  { %v269_v44 = vpop.f32.mrf.mxu2 }
  0xbe   :  { %v293_v45 = vmax.f32 %v264_v43, 0.0 }
  0xbf   :  { %v160_v46 = vpop.f32.mrf.mxu0 }
  0xc0   :  { %v161_v47 = vadd.f32 %v714_v13, %v160_v46  ;;  %305 = vst.msk [vmem:[%s782_s3 + $0x18] sm:$0xff] %vm94_vm0, %v293_v45 }
  0xc1   :  { %v213_v48 = vpop.f32.mrf.mxu1 }
  0xc2   :  { %v214_v49 = vadd.f32 %v213_v48, %v161_v47 }
  0xc4   :  { %v267_v50 = vadd.f32 %v266_v36, %v214_v49 }
  0xc5   :  { %v228_v51 = vpop.f32.mrf.mxu3 }
  0xc6   :  { %v272_v52 = vpop.f32.mrf.mxu2  ;;  %v294_v53 = vmax.f32 %v267_v50, 0.0  ;;  %v229_v14 = vadd.f32 %v228_v51, %v176_v10 }
  0xc7   :  { %v163_v54 = vpop.f32.mrf.mxu0 }
  0xc8   :  { %v164_v55 = vadd.f32 %v714_v13, %v163_v54  ;;  %306 = vst.msk [vmem:[%s782_s3 + $0x20] sm:$0xff] %vm94_vm0, %v294_v53 }
  0xc9   :  { %v216_v56 = vpop.f32.mrf.mxu1 }
  0xca   :  { %v217_v57 = vadd.f32 %v216_v56, %v164_v55 }
  0xcc   :  { %v270_v58 = vadd.f32 %v269_v44, %v217_v57 }
  0xcd   :  { %v231_v59 = vpop.f32.mrf.mxu3 }
  0xce   :  { %v275_v60 = vpop.f32.mrf.mxu2  ;;  %v295_v61 = vmax.f32 %v270_v58, 0.0  ;;  %v232_v28 = vadd.f32 %v231_v59, %v179_v26 }
  0xcf   :  { %v166_v62 = vpop.f32.mrf.mxu0 }
  0xd0   :  { %v167_v63 = vadd.f32 %v714_v13, %v166_v62  ;;  %307 = vst.msk [vmem:[%s782_s3 + $0x28] sm:$0xff] %vm94_vm0, %v295_v61 }
  0xd1   :  { %v219_v0 = vpop.f32.mrf.mxu1 }
  0xd2   :  { %v220_v1 = vadd.f32 %v219_v0, %v167_v63 }
  0xd4   :  { %v273_v2 = vadd.f32 %v272_v52, %v220_v1 }
  0xd5   :  { %v234_v3 = vpop.f32.mrf.mxu3 }
  0xd6   :  { %v278_v4 = vpop.f32.mrf.mxu2  ;;  %v296_v5 = vmax.f32 %v273_v2, 0.0  ;;  %v235_v12 = vadd.f32 %v234_v3, %v182_v8 }
  0xd7   :  { %v169_v6 = vpop.f32.mrf.mxu0 }
  0xd8   :  { %v170_v7 = vadd.f32 %v714_v13, %v169_v6  ;;  %308 = vst.msk [vmem:[%s782_s3 + $0x30] sm:$0xff] %vm94_vm0, %v296_v5 }
  0xd9   :  { %v222_v9 = vpop.f32.mrf.mxu1 }
  0xda   :  { %v223_v11 = vadd.f32 %v222_v9, %v170_v7 }
  0xdc   :  { %v276_v15 = vadd.f32 %v275_v60, %v223_v11 }
  0xdd   :  { %v287_v16 = vpop.f32.mrf.mxu3 }
  0xde   :  { %v288_v17 = vadd.f32 %v287_v16, %v235_v12  ;;  %v281_v18 = vpop.f32.mrf.mxu2  ;;  %v297_v19 = vmax.f32 %v276_v15, 0.0 }
  0xdf   :  { %v282_v20 = vadd.f32 %v281_v18, %v229_v14  ;;  %v172_v21 = vpop.f32.mrf.mxu0 }
  0xe0   :  { %v301_v22 = vmax.f32 %v288_v17, 0.0  ;;  %v173_v24 = vadd.f32 %v714_v13, %v172_v21  ;;  %309 = vst.msk [vmem:[%s782_s3 + $0x38] sm:$0xff] %vm94_vm0, %v297_v19 }
  0xe1   :  { %v299_v25 = vmax.f32 %v282_v20, 0.0  ;;  %v225_v23 = vpop.f32.mrf.mxu1 }
  0xe2   :  { %313 = vst.msk [vmem:[%s782_s3 + $0x58] sm:$0xff] %vm94_vm0, %v301_v22  ;;  %v226_v27 = vadd.f32 %v225_v23, %v173_v24 }
  0xe3   :  { %311 = vst.msk [vmem:[%s782_s3 + $0x48] sm:$0xff] %vm94_vm0, %v299_v25 }
  0xe4   :  { %v279_v29 = vadd.f32 %v278_v4, %v226_v27 }
  0xe6   :  { %v284_v30 = vpop.f32.mrf.mxu2  ;;  %v298_v31 = vmax.f32 %v279_v29, 0.0 }
  0xe7   :  { %v285_v33 = vadd.f32 %v284_v30, %v232_v28 }
  0xe8   :  { %310 = vst.msk [vmem:[%s782_s3 + $0x40] sm:$0xff] %vm94_vm0, %v298_v31 }
  0xe9   :  { %v300_v34 = vmax.f32 %v285_v33, 0.0 }
  0xeb   :  { %312 = vst.msk [vmem:[%s782_s3 + $0x50] sm:$0xff] %vm94_vm0, %v300_v34 }

</bundles_post_ra>
